<compile_context>
chip_gen: v7x
topology: tpu7x:2x2x1
jax: 0.10.0
libtpu: 0.0.40
codegen_flags: <defaults>
</compile_context>

<pallas_src>
import jax
import jax.numpy as jnp
from jax.experimental import pallas as pl
from jax.experimental.pallas import tpu as pltpu


def _round_up(n, m):
    return ((n + m - 1) // m) * m


def _pick_vmem_limit():
    # ~3/4 of physical VMEM per TensorCore, capped at 112 MiB.
    # (v5e/v6e: 128 MiB physical; v7x: 64 MiB physical.)
    try:
        cap = int(pltpu.get_tpu_info().vmem_capacity_bytes)
    except Exception:
        cap = 64 << 20
    return max(32 << 20, min((cap * 3) // 4, 112 << 20))


def mlp_kernel(x_ref, w1_ref, b1_ref, w2_ref, b2_ref, o_ref, acc_ref):
    """One (batch-tile, hidden-tile) grid step.

    h   = relu(x @ w1[:, chunk] + b1[chunk])      # BN(eval)+bias folded into w1/b1
    acc += h @ w2[chunk, :]                        # f32 accumulator in VMEM scratch
    Dropout(p): identity in eval mode.
    """
    j = pl.program_id(1)

    @pl.when(j == 0)
    def _init():
        acc_ref[...] = jnp.zeros_like(acc_ref)

    h = jnp.dot(x_ref[...], w1_ref[...], preferred_element_type=jnp.float32)
    h = jnp.maximum(h + b1_ref[...], 0.0)
    acc_ref[...] += jnp.dot(h.astype(w2_ref.dtype), w2_ref[...],
                            preferred_element_type=jnp.float32)

    @pl.when(j == pl.num_programs(1) - 1)
    def _finalize():
        o_ref[...] = (acc_ref[...] + b2_ref[...]).astype(o_ref.dtype)


def prepare_params(params, *, eps=1e-5, compute_dtype=jnp.bfloat16, hidden_tile=512):
    """One-time (per weight set) fold/pad/cast. Call once, reuse across forwards.

    - Folds eval-mode BatchNorm1d + first bias into the first Linear.
    - Pads in_dim / hidden / out_dim to 128-multiples (MXU / lane alignment).
    - Casts weights to compute_dtype (bf16 by default); biases stay f32.
    """
    w1, b1, gamma, beta, mean, var, w2, b2 = params
    in_dim, hidden = w1.shape
    out_dim = w2.shape[1]

    # Fold eval-mode BN + first bias: y = (x@w1 + b1 - mean)*scale + beta
    scale = gamma * jax.lax.rsqrt(var + eps)                 # (1, H)
    w1f = w1 * scale                                         # (in_dim, H)
    b1f = (b1 - mean) * scale + beta                         # (1, H)

    in_pad = _round_up(in_dim, 128)
    th = min(_round_up(hidden_tile, 128), _round_up(hidden, 128))
    hidden_pad = _round_up(hidden, th)
    out_pad = _round_up(max(out_dim, 1), 128)

    w1p = jnp.zeros((in_pad, hidden_pad), compute_dtype)
    w1p = w1p.at[:in_dim, :hidden].set(w1f.astype(compute_dtype))
    b1p = jnp.zeros((1, hidden_pad), jnp.float32).at[:, :hidden].set(
        b1f.astype(jnp.float32))
    w2p = jnp.zeros((hidden_pad, out_pad), compute_dtype)
    w2p = w2p.at[:hidden, :out_dim].set(w2.astype(compute_dtype))
    b2p = jnp.zeros((1, out_pad), jnp.float32).at[:, :out_dim].set(
        b2.astype(jnp.float32))

    meta = dict(in_dim=in_dim, in_pad=in_pad, hidden=hidden, hidden_pad=hidden_pad,
                hidden_tile=th, out_dim=out_dim, out_pad=out_pad)
    return (w1p, b1p, w2p, b2p, meta)


def mlp_forward(x, prepared, *, max_batch_tile=512, min_batch_tiles=2,
                out_dtype=jnp.float32, vmem_limit_bytes=None):
    """Fused eval-mode MLP forward. x: (B, in_dim). `prepared` from prepare_params."""
    w1p, b1p, w2p, b2p, meta = prepared
    in_dim, in_pad = meta["in_dim"], meta["in_pad"]
    hidden_pad, th = meta["hidden_pad"], meta["hidden_tile"]
    out_dim, out_pad = meta["out_dim"], meta["out_pad"]
    B = x.shape[0]
    assert x.shape[1] == in_dim, "x feature dim mismatch"
    compute_dtype = w1p.dtype

    # Batch tile: minimize padding, keep sublane-dense multiple (16 for bf16, 8 for
    # f32), and expose >=2 parallel grid steps when possible (v7x has 2 TCs).
    sub = 8 if jnp.dtype(compute_dtype).itemsize >= 4 else 16
    ntiles = int(pl.cdiv(B, max_batch_tile))
    if ntiles < min_batch_tiles and B >= min_batch_tiles * sub:
        ntiles = min_batch_tiles
    tb = _round_up(int(pl.cdiv(B, ntiles)), sub)
    b_pad = ntiles * tb

    xp = x.astype(compute_dtype)
    if (b_pad, in_pad) != xp.shape:
        xp = jnp.zeros((b_pad, in_pad), compute_dtype).at[:B, :in_dim].set(xp)

    grid = (ntiles, hidden_pad // th)

    if vmem_limit_bytes is None:
        vmem_limit_bytes = _pick_vmem_limit()

    nbytes = lambda a: a.size * a.dtype.itemsize
    cost = pl.CostEstimate(
        flops=int(2 * b_pad * (in_pad * hidden_pad + hidden_pad * out_pad)),
        transcendentals=0,
        bytes_accessed=int(nbytes(xp) + nbytes(w1p) + nbytes(b1p)
                           + nbytes(w2p) + nbytes(b2p)
                           + b_pad * out_pad * jnp.dtype(out_dtype).itemsize),
    )

    out = pl.pallas_call(
        mlp_kernel,
        out_shape=jax.ShapeDtypeStruct((b_pad, out_pad), out_dtype),
        grid_spec=pltpu.PrefetchScalarGridSpec(
            num_scalar_prefetch=0,
            grid=grid,
            in_specs=[
                pl.BlockSpec((tb, in_pad), lambda i, j: (i, 0)),    # x: batch tile
                pl.BlockSpec((in_pad, th), lambda i, j: (0, j)),    # w1: hidden tile
                pl.BlockSpec((1, th), lambda i, j: (0, j)),         # b1: hidden tile
                pl.BlockSpec((th, out_pad), lambda i, j: (j, 0)),   # w2: hidden tile
                pl.BlockSpec((1, out_pad), lambda i, j: (0, 0)),    # b2: resident
            ],
            out_specs=pl.BlockSpec((tb, out_pad), lambda i, j: (i, 0)),
            scratch_shapes=[pltpu.VMEM((tb, out_pad), jnp.float32)],
        ),
        compiler_params=pltpu.CompilerParams(
            dimension_semantics=("parallel", "arbitrary"),
            vmem_limit_bytes=int(vmem_limit_bytes),
        ),
        cost_estimate=cost,
    )(xp, w1p, b1p, w2p, b2p)

    return out[:B, :out_dim]


def make_params(key, in_dim, hidden, out_dim):
    k1, k2, k3, k4 = jax.random.split(key, 4)
    lim1 = 1.0 / jnp.sqrt(in_dim)
    lim2 = 1.0 / jnp.sqrt(hidden)
    w1 = jax.random.uniform(k1, (in_dim, hidden), jnp.float32, -lim1, lim1)
    b1 = jax.random.uniform(k2, (1, hidden), jnp.float32, -lim1, lim1)
    w2 = jax.random.uniform(k3, (hidden, out_dim), jnp.float32, -lim2, lim2)
    b2 = jax.random.uniform(k4, (1, out_dim), jnp.float32, -lim2, lim2)
    # BatchNorm1d init: weight=1, bias=0, running_mean=0, running_var=1
    gamma = jnp.ones((1, hidden), jnp.float32)
    beta = jnp.zeros((1, hidden), jnp.float32)
    mean = jnp.zeros((1, hidden), jnp.float32)
    var = jnp.ones((1, hidden), jnp.float32)
    return (w1, b1, gamma, beta, mean, var, w2, b2)


def mlp_reference(x, params, eps=1e-5):
    (w1, b1, gamma, beta, mean, var, w2, b2) = params
    h = x @ w1 + b1
    h = (h - mean) * jax.lax.rsqrt(var + eps) * gamma + beta
    h = jnp.maximum(h, 0.0)
    return h @ w2 + b2


if __name__ == "__main__":
    key = jax.random.PRNGKey(0)
    kx, kp = jax.random.split(key)

    B, in_dim, hidden, out_dim = 16, 32, 256, 16
    x = jax.random.normal(kx, (B, in_dim), jnp.float32)
    params = make_params(kp, in_dim, hidden, out_dim)
    ref = mlp_reference(x, params)

    # f32-operand path: tight check of the fused BN/bias/ReLU semantics.
    prep_f32 = prepare_params(params, compute_dtype=jnp.float32, hidden_tile=128)
    out_f32 = jax.block_until_ready(mlp_forward(x, prep_f32))
    assert out_f32.shape == (B, out_dim)
    assert jnp.allclose(out_f32, ref, atol=1e-4, rtol=1e-4), "f32 mismatch vs reference"

    # bf16-operand path (default, MXU-friendly): relaxed tolerance per dtype.
    prep_bf16 = prepare_params(params, compute_dtype=jnp.bfloat16, hidden_tile=128)
    out_bf16 = jax.block_until_ready(mlp_forward(x, prep_bf16))
    assert out_bf16.shape == (B, out_dim)
    assert jnp.allclose(out_bf16, ref, atol=5e-2, rtol=5e-2), "bf16 mismatch vs reference"

    print("KERNEL_OK")
</pallas_src>

<mosaic_0001>
module attributes {stable_mosaic.version = 11 : i64} {
  func.func @mlp_kernel(%arg0: i32, %arg1: i32, %arg2: memref<8x128xf32, #tpu.memory_space<vmem>>, %arg3: memref<128x128xf32, #tpu.memory_space<vmem>>, %arg4: memref<1x128xf32, #tpu.memory_space<vmem>>, %arg5: memref<128x128xf32, #tpu.memory_space<vmem>>, %arg6: memref<1x128xf32, #tpu.memory_space<vmem>>, %arg7: memref<8x128xf32, #tpu.memory_space<vmem>>, %arg8: memref<8x128xf32, #tpu.memory_space<vmem>>) attributes {dimension_semantics = [#tpu.dimension_semantics<parallel>, #tpu.dimension_semantics<arbitrary>], iteration_bounds = array<i64: 2, 2>, scalar_prefetch = 0 : i64, scratch_operands = 1 : i64, tpu.core_type = #tpu.core_type<tc>, window_params = [{transform_indices = @transform_0, window_bounds = array<i64: 8, 128>}, {transform_indices = @transform_1, window_bounds = array<i64: 128, 128>}, {transform_indices = @transform_2, window_bounds = array<i64: 1, 128>}, {transform_indices = @transform_3, window_bounds = array<i64: 128, 128>}, {pipeline_mode = #tpu.pipeline_mode<synchronous>, transform_indices = @transform_4, window_bounds = array<i64: 1, 128>}, {transform_indices = @transform_5, window_bounds = array<i64: 8, 128>}]} {
    %c0_i32 = arith.constant 0 : i32
    %0 = arith.cmpi eq, %arg1, %c0_i32 : i32
    %1 = arith.extui %0 : i1 to i32
    %c0_i32_0 = arith.constant 0 : i32
    %2 = arith.cmpi ne, %1, %c0_i32_0 : i32
    scf.if %2 {
      %cst_15 = arith.constant 0.000000e+00 : f32
      %19 = vector.broadcast %cst_15 : f32 to vector<8x128xf32>
      %c0_16 = arith.constant 0 : index
      %c0_17 = arith.constant 0 : index
      %20 = vector.load %arg8[%c0_16, %c0_17] : memref<8x128xf32, #tpu.memory_space<vmem>>, vector<8x128xf32>
      tpu.vector_store %arg8[%c0_16, %c0_17], %19 {strides = array<i32>} : memref<8x128xf32, #tpu.memory_space<vmem>>, vector<8x128xf32>,
    } else {
    }
    %c0 = arith.constant 0 : index
    %c0_1 = arith.constant 0 : index
    %3 = vector.load %arg2[%c0, %c0_1] : memref<8x128xf32, #tpu.memory_space<vmem>>, vector<8x128xf32>
    %c0_2 = arith.constant 0 : index
    %c0_3 = arith.constant 0 : index
    %4 = vector.load %arg3[%c0_2, %c0_3] : memref<128x128xf32, #tpu.memory_space<vmem>>, vector<128x128xf32>
    %cst = arith.constant dense<0.000000e+00> : vector<8x128xf32>
    %5 = tpu.matmul %3, %4, %cst {dimension_numbers = #tpu.dot_dimension_numbers<[1], [0], [0], [1], [0, 0, 1, 1], [], []>} : vector<8x128xf32>, vector<128x128xf32>, vector<8x128xf32> -> vector<8x128xf32>
    %c0_4 = arith.constant 0 : index
    %c0_5 = arith.constant 0 : index
    %6 = vector.load %arg4[%c0_4, %c0_5] : memref<1x128xf32, #tpu.memory_space<vmem>>, vector<1x128xf32>
    %7 = vector.broadcast %6 : vector<1x128xf32> to vector<8x128xf32>
    %8 = arith.addf %5, %7 : vector<8x128xf32>
    %cst_6 = arith.constant 0.000000e+00 : f32
    %9 = vector.broadcast %cst_6 : f32 to vector<8x128xf32>
    %10 = arith.maximumf %8, %9 : vector<8x128xf32>
    %c0_7 = arith.constant 0 : index
    %c0_8 = arith.constant 0 : index
    %11 = vector.load %arg8[%c0_7, %c0_8] : memref<8x128xf32, #tpu.memory_space<vmem>>, vector<8x128xf32>
    %c0_9 = arith.constant 0 : index
    %c0_10 = arith.constant 0 : index
    %12 = vector.load %arg5[%c0_9, %c0_10] : memref<128x128xf32, #tpu.memory_space<vmem>>, vector<128x128xf32>
    %cst_11 = arith.constant dense<0.000000e+00> : vector<8x128xf32>
    %13 = tpu.matmul %10, %12, %cst_11 {dimension_numbers = #tpu.dot_dimension_numbers<[1], [0], [0], [1], [0, 0, 1, 1], [], []>} : vector<8x128xf32>, vector<128x128xf32>, vector<8x128xf32> -> vector<8x128xf32>
    %14 = arith.addf %11, %13 : vector<8x128xf32>
    %c0_12 = arith.constant 0 : index
    %c0_13 = arith.constant 0 : index
    %15 = vector.load %arg8[%c0_12, %c0_13] : memref<8x128xf32, #tpu.memory_space<vmem>>, vector<8x128xf32>
    tpu.vector_store %arg8[%c0_12, %c0_13], %14 {strides = array<i32>} : memref<8x128xf32, #tpu.memory_space<vmem>>, vector<8x128xf32>,
    %c1_i32 = arith.constant 1 : i32
    %16 = arith.cmpi eq, %arg1, %c1_i32 : i32
    %17 = arith.extui %16 : i1 to i32
    %c0_i32_14 = arith.constant 0 : i32
    %18 = arith.cmpi ne, %17, %c0_i32_14 : i32
    scf.if %18 {
      %c0_15 = arith.constant 0 : index
      %c0_16 = arith.constant 0 : index
      %19 = vector.load %arg8[%c0_15, %c0_16] : memref<8x128xf32, #tpu.memory_space<vmem>>, vector<8x128xf32>
      %c0_17 = arith.constant 0 : index
      %c0_18 = arith.constant 0 : index
      %20 = vector.load %arg6[%c0_17, %c0_18] : memref<1x128xf32, #tpu.memory_space<vmem>>, vector<1x128xf32>
      %21 = vector.broadcast %20 : vector<1x128xf32> to vector<8x128xf32>
      %22 = arith.addf %19, %21 : vector<8x128xf32>
      %c0_19 = arith.constant 0 : index
      %c0_20 = arith.constant 0 : index
      %23 = vector.load %arg7[%c0_19, %c0_20] : memref<8x128xf32, #tpu.memory_space<vmem>>, vector<8x128xf32>
      tpu.vector_store %arg7[%c0_19, %c0_20], %22 {strides = array<i32>} : memref<8x128xf32, #tpu.memory_space<vmem>>, vector<8x128xf32>,
    } else {
    }
    return
  }
  func.func @transform_0(%arg0: i32, %arg1: i32) -> (i32, i32) {
    %c0_i32 = arith.constant 0 : i32
    %c0_i32_0 = arith.constant 0 : i32
    return %arg0, %c0_i32 : i32, i32
  }
  func.func @transform_1(%arg0: i32, %arg1: i32) -> (i32, i32) {
    %c0_i32 = arith.constant 0 : i32
    %c0_i32_0 = arith.constant 0 : i32
    return %c0_i32, %arg1 : i32, i32
  }
  func.func @transform_2(%arg0: i32, %arg1: i32) -> (i32, i32) {
    %c0_i32 = arith.constant 0 : i32
    %c0_i32_0 = arith.constant 0 : i32
    return %c0_i32, %arg1 : i32, i32
  }
  func.func @transform_3(%arg0: i32, %arg1: i32) -> (i32, i32) {
    %c0_i32 = arith.constant 0 : i32
    %c0_i32_0 = arith.constant 0 : i32
    return %arg1, %c0_i32 : i32, i32
  }
  func.func @transform_4(%arg0: i32, %arg1: i32) -> (i32, i32) {
    %c0_i32 = arith.constant 0 : i32
    %c0_i32_0 = arith.constant 0 : i32
    %c0_i32_1 = arith.constant 0 : i32
    return %c0_i32, %c0_i32_0 : i32, i32
  }
  func.func @transform_5(%arg0: i32, %arg1: i32) -> (i32, i32) {
    %c0_i32 = arith.constant 0 : i32
    %c0_i32_0 = arith.constant 0 : i32
    return %arg0, %c0_i32 : i32, i32
  }
}

</mosaic_0001>

<bundles_post_ra>
// kernel: tpu_custom_call.1
= control target key start
LH: loop header
LB: loop body
LE: loop exit
PB: predicated region body
PF: predicated region fallthrough
CT: control target
= control target key end

     0   :  { %s1664_s0 = inlined_call_operand.hbm [shape: f32[16,128], index: 0, kind: input, shape index: {}]   ;;  %s1665_s1 = inlined_call_operand.hbm [shape: f32[128,256], index: 1, kind: input, shape index: {}]   ;;  %s1666_s2 = inlined_call_operand.vmem [shape: f32[1,256], index: 2, kind: input, shape index: {}]   ;;  %s1667_s3 = inlined_call_operand.hbm [shape: f32[256,128], index: 3, kind: input, shape index: {}]   ;;  %s1668_s4 = inlined_call_operand.vmem [shape: f32[1,128], index: 4, kind: input, shape index: {}]   ;;  %s1669_s5 = inlined_call_operand.hbm [shape: f32[16,128], index: 5, kind: output, shape index: {}]  }
   0x1   :  { %1682 = sst [smem:[#allocation20_spill]] %s1665_s1 }
   0x2   :  { %1683 = sst [smem:[#allocation21_spill]] %s1666_s2 }
   0x3   :  { %1684 = sst [smem:[#allocation22_spill]] %s1668_s4 }
   0x4   :  { %1685 = sst [smem:[#allocation23_spill]] %s1669_s5 }
   0x5   :  { %10 = vsyncpa [#allocation4], 0 }
   0x6   :  { %12 = vsyncpa [#allocation4 + $0x1], 0 }
   0x7   :  { %13 = vsyncpa [#allocation7], 0 }
   0x8   :  { %15 = vsyncpa [#allocation7 + $0x1], 0 }
   0x9   :  { %16 = vsyncpa [#allocation5], 0 }
   0xa   :  { %18 = vsyncpa [#allocation5 + $0x1], 0  ;;  %s1248_s18 = smov 0   ;;  %s1250_s19 = smov 0  }
   0xb   :  { %s1252_s20 = smov 0   ;;  %s1254_s21 = smov 0  }
   0xc   :  { %s1256_s22 = smov 0   ;;  %s1258_s23 = smov 0  }
   0xd   :  { %s1260_s24 = smov 0   ;;  %s1262_s25 = smov 0  }
   0xe   :  { %s1264_s26 = smov 0   ;;  %s1266_s27 = smov 0  }
   0xf   :  { %s1268_s28 = smov 0  }
  0x10 LB: > { %1686 = sst [smem:[#allocation13_spill]] %s1185_s23  ;;  %p51_p0 = scmp.eq.s32.totalorder %s1205_s28, 0  ;;  %s1205_s28 = sphi %s1268_s28, %s24_s28   ;;  %s1201_s27 = sphi %s1266_s27, %s1723_s27   ;;  %s1197_s26 = sphi %s1264_s26, %s1730_s26   ;;  %s1193_s25 = sphi %s1262_s25, %s1721_s25   ;;  %s1189_s24 = sphi %s1260_s24, %s1729_s24   ;;  %s1185_s23 = sphi %s1258_s23, %s1720_s23   ;;  %s1181_s22 = sphi %s1256_s22, %s1728_s22   ;;  %s1177_s21 = sphi %s1254_s21, %s1727_s21   ;;  %s1173_s20 = sphi %s1252_s20, %s1726_s20   ;;  %s1169_s19 = sphi %s1250_s19, %s1725_s19   ;;  %s1165_s18 = sphi %s1248_s18, %s1724_s18  }
  0x11   : > { %1687 = sst [smem:[#allocation14_spill]] %s1193_s25  ;;  %p76_p1 = scmp.ne.s32.totalorder %s1173_s20, %s1169_s19 }
  0x12   : > { %1688 = sst [smem:[#allocation15_spill]] %s1201_s27  ;;  %p1670_p2 = scmp.lt.s32.totalorder %s1205_s28, 4 }
  0x13   : > { %s226_s30 = sand.u32 1, %s1205_s28   ;;  %p78_p3 = por %p76_p1, %p51_p0 }
  0x14   : > { %s228_s6 = sand.u32 1, %s1173_s20   ;;  %s700_s7 = sshll.u32 %s1197_s26, 7 }
  0x15   : > { %s1313_s8 = sshll.u32 %s228_s6, 7  ;;  %s1689_s1 = sld [smem:[#allocation20_spill]] }
  0x16   : > { %p1322_p4 = pnand %p1670_p2, %p78_p3  ;;  %s230_s13 = scalar_lea.vmem [#allocation6], %s1313_s8 }
  0x17   : > { %s236_s14 = sshll.u32 %s230_s13, 4  ;;  %s1329_s15 = scalar_lea.sflag [#allocation7], %s226_s30  ;;  %s1327_s14 = int_to_ptr.vmem [resolvable:$true] %s236_s14 }
  0x18   : > { %p1675_p6 = pneg %p1322_p4 }
  0x1b   : > { %s1318_s11 = scalar_lea.hbm %s1689_s1, %s700_s7  ;;  %s994_s7 = scalar_lea.hbm %s1689_s1, 4096 }
  0x1c   : > { %s989_s16 = scalar_lea.hbm %s1318_s11, 2048  ;;  %p995_p9 = scmp.lt.u32.totalorder %s1318_s11, %s1689_s1 }
  0x1d   : > { %p990_p5 = scmp.ne.s32.totalorder %s1318_s11, %s989_s16  ;;  %p996_p10 = scmp.lt.u32.totalorder %s994_s7, %s989_s16 }
  0x1e   : > { %p998_p12 = scmp.lt.u32.totalorder %s989_s16, %s1318_s11 }
  0x1f   : > { %p992_p7 = pnand %p1675_p6, %p990_p5  ;;  %p997_p11 = por %p996_p10, %p995_p9 }
  0x21   : > { %p993_p8 = pneg %p992_p7  ;;  %p999_p13 = por %p998_p12, %p997_p11 }
  0x23   : > { %p1000_p1 = pnand %p999_p13, %p993_p8 }
  0x25   : > { %1003 = shalt.err (!%p1000_p1)
}
  0x26   : > { %s1004_s30 = scalar_lea.vmem %s1327_s14, 2048  ;;  %s1207_s13 = smov [#allocation6]  }
  0x27   : > { %p1005_p3 = scmp.ne.s32.totalorder %s1327_s14, %s1004_s30  ;;  %s1009_s17 = sshll.u32 %s1207_s13, 4  ;;  %s1010_s17 = int_to_ptr.vmem [resolvable:$false] %s1009_s17 }
  0x28   : > { %s1011_s6 = scalar_lea.vmem %s1010_s17, 4096  ;;  %p1012_p2 = scmp.lt.s32.totalorder %s1327_s14, %s1010_s17 }
  0x29   : > { %p1007_p5 = pnand %p1005_p3, %p1675_p6  ;;  %p1013_p9 = scmp.lt.s32.totalorder %s1011_s6, %s1004_s30 }
  0x2b   : > { %p1008_p7 = pneg %p1007_p5  ;;  %p1014_p10 = por %p1013_p9, %p1012_p2 }
  0x2d   : > { %p1015_p11 = pnand %p1014_p10, %p1008_p7 }
  0x2f   : > { %1018 = shalt.err (!%p1015_p11)
}
  0x30   : > { %s1208_s16 = smov 256   ;;  %s1671_s7 = smov 128  }
  0x31   : > { %s1672_s9 = smov 8   ;;  %p704_p2 = scmp.ge.s32.totalorder %s1205_s28, 1 }
  0x32   : > { %884 = dma.hbm_to_vmem [thread:$0]  (!%p1322_p4), %s1318_s11, 2048, %s1327_s14, %s1329_s15, %s1208_s16, %s1671_s7, %s1672_s9  }
  0x33   : > { %p271_p8 = scmp.lt.s32.totalorder %s1205_s28, 5  ;;  %s1366_s30 = sadd.s32 4294967295, %s1205_s28  }
  0x34   : > { %s694_s13 = sadd.s32 4294967294, %s1205_s28   ;;  %s33_s17 = sadd.s32 1, %s1197_s26 }
  0x35   : > { %p1361_p12 = pnand %p704_p2, %p271_p8  ;;  %p34_p13 = scmp.ge.s32.totalorder %s33_s17, 2 }
  0x36   : > { %s36_s6 = sadd.s32 1, %s1201_s27  ;;  %s43_s11 = sadd.s32 1, %s1185_s23 }
  0x37   : > { %s1691_s10 = scalar_select %p1361_p12, 1, 0 }
  0x38   : > { %p50_p1 = scmp.ne.s32.totalorder %s1185_s23, %s1181_s22  ;;  %s1732_s17 = smov (%p34_p13, %s33_s17), 0 }
  0x39   : > { %1692 = sst [smem:[#allocation16_spill]] %s1732_s17  ;;  %s1734_s6 = smov (!%p34_p13, %s36_s6), %s1201_s27 }
  0x3a   : > { %p1382_p3 = por %p51_p0, %p50_p1  ;;  %p56_p5 = scmp.ne.s32.totalorder %s1181_s22, %s1177_s21 }
  0x3b   : > { %p38_p7 = scmp.ge.s32.totalorder %s1734_s6, 2  ;;  %p57_p9 = scmp.eq.s32.totalorder %s1366_s30, 0 }
  0x3c   : > { %s66_s16 = ssub.s32 %s1197_s26, %s1732_s17  ;;  %p82_p10 = scmp.ne.s32.totalorder %s1169_s19, %s1165_s18 }
  0x3d   : > { %s1736_s6 = smov (%p38_p7, %s1734_s6), 0  ;;  %p1398_p11 = por %p57_p9, %p56_p5 }
  0x3e   : > { %1694 = sst [smem:[#allocation17_spill]] %s1736_s6  ;;  %p67_p0 = scmp.eq.s32.totalorder %s66_s16, 0 }
  0x3f   : > { %s1695_s7 = scalar_select %p1398_p11, 1, 0 }
  0x40   : > { %s40_s9 = ssub.s32 %s1201_s27, %s1736_s6  ;;  %p1404_p2 = por %p82_p10, %p57_p9 }
  0x41   : > { %p41_p8 = scmp.eq.s32.totalorder %s40_s9, 0  ;;  %p179_p13 = scmp.eq.s32.totalorder %s1366_s30, 3 }
  0x42   : > { %s1696_s29 = scalar_select %p1404_p2, 1, 0 }
  0x43   : > { %s1697_s1 = sadd.s32 1, %s1173_s20  ;;  %p1420_p7 = por %p179_p13, %p50_p1 }
  0x44   : > { %s1412_s18 = scalar_select %p67_p0, %s1173_s20, %s1697_s1  }
  0x45   : > { %s1415_s17 = scalar_select %p41_p8, %s1185_s23, %s43_s11  }
  0x46   : > { %1698 = sst [smem:[#allocation18_spill]] %s1412_s18  ;;  %p185_p6 = scmp.eq.s32.totalorder %s694_s13, 3 }
  0x47   : > { %1699 = sst [smem:[#allocation19_spill]] %s1415_s17  ;;  %s208_s25 = sand.u32 1, %s1185_s23  }
  0x48   : > { %s1700_s5 = scalar_select %p1420_p7, 1, 0 }
  0x49   : > { %s698_s16 = sshll.u32 %s1201_s27, 7  ;;  %p1429_p9 = por %p185_p6, %p56_p5 }
  0x4a   : > { %s697_s9 = sshll.u32 %s208_s25, 3  ;;  %s1436_s1 = scalar_lea.hbm %s1664_s0, %s698_s16 }
  0x4b   : > { %s1701_s6 = scalar_select %p1429_p9, 1, 0 }
  0x4c   : > { %p1702_p10 = scmp.lt.s32.totalorder %s1205_s28, 4  ;;  %s212_s11 = scalar_lea.vmem [#allocation3], %s697_s9 }
  0x4d   : > { %s219_s27 = sshll.u32 %s212_s11, 4  ;;  %s209_s17 = scalar_lea.sflag [#allocation4], %s208_s25  ;;  %s1446_s27 = int_to_ptr.vmem [resolvable:$true] %s219_s27 }
  0x4e   : > { %p1442_p1 = pnand %p1702_p10, %p1382_p3  ;;  %s1019_s2 = scalar_lea.hbm %s1436_s1, 128 }
  0x4f   : > { %p1020_p6 = scmp.ne.s32.totalorder %s1436_s1, %s1019_s2  ;;  %s1024_s16 = scalar_lea.hbm %s1664_s0, 256 }
  0x50   : > { %p1021_p5 = pneg %p1442_p1  ;;  %p1025_p3 = scmp.lt.u32.totalorder %s1436_s1, %s1664_s0 }
  0x51   : > { %p1026_p13 = scmp.lt.u32.totalorder %s1024_s16, %s1019_s2  ;;  %p1028_p9 = scmp.lt.u32.totalorder %s1019_s2, %s1436_s1 }
  0x52   : > { %p1022_p0 = pnand %p1021_p5, %p1020_p6 }
  0x53   : > { %p1027_p10 = por %p1026_p13, %p1025_p3 }
  0x54   : > { %p1023_p8 = pneg %p1022_p0 }
  0x55   : > { %p1029_p7 = por %p1028_p9, %p1027_p10 }
  0x57   : > { %p1030_p2 = pnand %p1029_p7, %p1023_p8 }
  0x59   : > { %1033 = shalt.err (!%p1030_p2)
}
  0x5a   : > { %s1034_s25 = scalar_lea.vmem %s1446_s27, 128  ;;  %s1211_s9 = smov [#allocation3]  }
  0x5b   : > { %p1035_p6 = scmp.ne.s32.totalorder %s1446_s27, %s1034_s25  ;;  %s1039_s11 = sshll.u32 %s1211_s9, 4  ;;  %s1040_s11 = int_to_ptr.vmem [resolvable:$false] %s1039_s11 }
  0x5c   : > { %s1041_s23 = scalar_lea.vmem %s1040_s11, 256  ;;  %p1042_p12 = scmp.lt.s32.totalorder %s1446_s27, %s1040_s11 }
  0x5d   : > { %p1037_p0 = pnand %p1035_p6, %p1021_p5  ;;  %p1043_p3 = scmp.lt.s32.totalorder %s1041_s23, %s1034_s25 }
  0x5f   : > { %p1038_p11 = pneg %p1037_p0  ;;  %p1044_p13 = por %p1043_p3, %p1042_p12 }
  0x61   : > { %p1045_p9 = pnand %p1044_p13, %p1038_p11 }
  0x63   : > { %1048 = shalt.err (!%p1045_p9)
}
  0x64   : > { %881 = dma.hbm_to_vmem [thread:$0]  (!%p1442_p1), %s1436_s1, 128, %s1446_s27, %s209_s17  }
  0x65   : > { %s717_s18 = sshll.u32 %s1197_s26, 11  ;;  %s256_s2 = scalar_lea.vmem [#allocation8], %s1313_s8 }
  0x66   : > { %s263_s4 = sshll.u32 %s256_s2, 4  ;;  %s1478_s9 = scalar_lea.hbm %s1667_s3, %s717_s18  ;;  %s1480_s4 = int_to_ptr.vmem [resolvable:$true] %s263_s4 }
  0x67   : > { %s1049_s13 = scalar_lea.hbm %s1478_s9, 2048  ;;  %p1704_p11 = pneg %p1322_p4 }
  0x68   : > { %p1050_p12 = scmp.ne.s32.totalorder %s1478_s9, %s1049_s13  ;;  %s1054_s17 = scalar_lea.hbm %s1667_s3, 4096 }
  0x69   : > { %p1055_p1 = scmp.lt.u32.totalorder %s1478_s9, %s1667_s3  ;;  %p1056_p5 = scmp.lt.u32.totalorder %s1054_s17, %s1049_s13 }
  0x6a   : > { %p1052_p2 = pnand %p1050_p12, %p1704_p11  ;;  %p1058_p10 = scmp.lt.u32.totalorder %s1049_s13, %s1478_s9 }
  0x6b   : > { %p1057_p8 = por %p1056_p5, %p1055_p1 }
  0x6c   : > { %p1053_p7 = pneg %p1052_p2 }
  0x6d   : > { %p1059_p6 = por %p1058_p10, %p1057_p8 }
  0x6f   : > { %p1060_p0 = pnand %p1059_p6, %p1053_p7 }
  0x71   : > { %1063 = shalt.err (!%p1060_p0)
}
  0x72   : > { %s1064_s11 = scalar_lea.vmem %s1480_s4, 2048  ;;  %p1705_p13 = pmov %p1704_p11 }
  0x73   : > { %p1065_p3 = scmp.ne.s32.totalorder %s1480_s4, %s1064_s11  ;;  %s1212_s23 = smov [#allocation8]  }
  0x74   : > { %s1069_s18 = sshll.u32 %s1212_s23, 4  ;;  %s1070_s18 = int_to_ptr.vmem [resolvable:$false] %s1069_s18 }
  0x75   : > { %p1067_p9 = pnand %p1065_p3, %p1705_p13  ;;  %s1071_s2 = scalar_lea.vmem %s1070_s18, 4096 }
  0x76   : > { %p1072_p11 = scmp.lt.s32.totalorder %s1480_s4, %s1070_s18  ;;  %p1073_p2 = scmp.lt.s32.totalorder %s1071_s2, %s1064_s11 }
  0x77   : > { %p1068_p12 = pneg %p1067_p9 }
  0x78   : > { %p1074_p1 = por %p1073_p2, %p1072_p11 }
  0x7a   : > { %p1075_p5 = pnand %p1074_p1, %p1068_p12 }
  0x7c   : > { %1078 = shalt.err (!%p1075_p5)
}
  0x7d   : > { %s1706_s14 = smov 8   ;;  %s1707_s16 = smov 128  }
  0x7e   : > { %887 = dma.hbm_to_vmem [thread:$0]  (!%p1322_p4), %s1478_s9, 2048, %s1480_s4, %s1329_s15, %s1707_s16, %s1707_s16, %s1706_s14  }
  0x7f   : > { %p1708_p7 = scmp.ne.s32.totalorder %s1691_s10, 0 }
  0x80   : > { %s1512_s13 = sand.u32 (!%p1708_p7), 1, %s1181_s22   ;;  %p1709_p8 = scmp.ne.s32.totalorder (!%p1708_p7), %s1695_s7, 0 }
  0x81   : > { %275 = sbr.rel (%p1708_p7) target bundleno = 656 (0x290), region = 40  ;;  %s705_s27 = sshll.u32 (!%p1708_p7), %s1512_s13, 3 }
  0x82   : > { %s278_s8 = scalar_lea.sflag (!%p1708_p7), [#allocation4], %s1512_s13  ;;  %s1516_s17 = scalar_lea.vmem (!%p1708_p7), [#allocation3], %s705_s27 }
  0x88   : > { %1152 = dma.done.wait (%p1709_p8), %s278_s8, 128  }
  0x89   : > { %1154 = vsyncadd (%p1709_p8), %s278_s8, 4294967168  ;;  %s286_s12 = sand.u32 1, %s1366_s30   ;;  %s288_s15 = sand.u32 1, %s1169_s19  }
  0x8a   : > { %s706_s10 = sshll.u32 %s288_s15, 7  ;;  %s287_s4 = scalar_lea.sflag [#allocation7], %s286_s12 }
  0x8b   : > { %s1524_s9 = scalar_lea.vmem [#allocation6], %s706_s10  ;;  %p1710_p4 = scmp.ne.s32.totalorder %s1696_s29, 0 }
  0x8d   : > { %1156 = dma.done.wait (%p1710_p4), %s287_s4, 4096  }
  0x8e   : > { %1158 = vsyncadd (%p1710_p4), %s287_s4, 4294963200  ;;  %p339_p10 = scmp.lt.s32.totalorder %s1189_s24, 1  ;;  %s1711_s11 = sld [smem:[#allocation21_spill]] }
  0x8f   : > { %s1538_s23 = scalar_lea.vmem [#allocation8], %s706_s10  ;;  %s1540_s18 = scalar_lea.vmem [#allocation9], %s705_s27 }
  0x90   : > { %s1532_s1 = scalar_select %p339_p10, %s1189_s24, 1 }
  0x91   : > { %p709_p6 = scmp.ne.s32.totalorder %s1189_s24, 0 }
  0x92   : > { %v1213_v0 = vmov (!%p709_p6), 0.0  }
  0x93   : > { %346 = sbr.rel (%p709_p6) target bundleno = 154 (0x9a), region = 56  ;;  %347 = vst [vmem:[#allocation2] sm:$0xff] (!%p709_p6), %v1213_v0 }
  0x94   : > { %s341_s30 = scalar_lea.vmem %s1711_s11, %s1532_s1 }
  0x9a PF: > { %v349_v1 = vld [vmem:[%s1524_s9] sm:$0xff]  ;;  %v350_v2 = vld [vmem:[%s1524_s9 + $0x8] sm:$0xff]  ;;  %v351_v3 = vld [vmem:[%s1524_s9 + $0x10] sm:$0xff]  ;;  %v1214_v4 = vmov 0.0|0.0   ;;  %vm1215_vm0 = vmmov 0   ;;  %v1216_v7 = vmov 0.0  }
  0x9b   : > { %822 = vmatprep.subr.bf16.mxu0 %v1214_v4  ;;  %v823_v5 = vpack.c.bf16 %v350_v2, %v349_v1  ;;  %v352_v6 = vld [vmem:[%s1524_s9 + $0x18] sm:$0xff]  ;;  %784 = vmatprep.mubr.msk.f32.mxu0 %vm1215_vm0, %v1216_v7  ;;  %v353_v9 = vld [vmem:[%s1524_s9 + $0x20] sm:$0xff]  ;;  %v354_v10 = vld [vmem:[%s1524_s9 + $0x28] sm:$0xff]  ;;  %p711_p0 = scmp.ne.s32.totalorder %s1189_s24, 1 }
  0x9c   : > { %846 = vmatprep.subr.bf16.mxu1 %v1214_v4  ;;  %819 = vmatprep.mubr.msk.f32.mxu1 %vm1215_vm0, %v1216_v7  ;;  %v826_v8 = vpack.c.bf16 %v352_v6, %v351_v3  ;;  %v444_v11 = vld [vmem:[%s1538_s23] sm:$0xff]  ;;  %v445_v12 = vld [vmem:[%s1538_s23 + $0x8] sm:$0xff]  ;;  %v446_v13 = vld [vmem:[%s1538_s23 + $0x10] sm:$0xff]  ;;  %v829_v15 = vpack.c.bf16 %v354_v10, %v353_v9  ;;  %s1713_s8 = sld [smem:[#allocation22_spill]] (!%p711_p0) }
  0x9d   : > { %824 = vmatpush3.bf16.msra.mxu0 %v823_v5  ;;  %v447_v14 = vld [vmem:[%s1538_s23 + $0x18] sm:$0xff]  ;;  %v847_v16 = vpack.c.bf16 %v445_v12, %v444_v11  ;;  %v355_v17 = vld [vmem:[%s1524_s9 + $0x30] sm:$0xff]  ;;  %v448_v20 = vld [vmem:[%s1538_s23 + $0x20] sm:$0xff] }
  0x9e   : > { %825 = vmatprep.subr.bf16.mxu0 %v1214_v4  ;;  %v356_v18 = vld [vmem:[%s1524_s9 + $0x38] sm:$0xff]  ;;  %v850_v19 = vpack.c.bf16 %v447_v14, %v446_v13  ;;  %v449_v21 = vld [vmem:[%s1538_s23 + $0x28] sm:$0xff]  ;;  %v357_v23 = vld [vmem:[%s1524_s9 + $0x40] sm:$0xff] }
  0x9f   : > { %848 = vmatpush3.bf16.msra.mxu1 %v847_v16  ;;  %v832_v22 = vpack.c.bf16 %v356_v18, %v355_v17  ;;  %v358_v24 = vld [vmem:[%s1524_s9 + $0x48] sm:$0xff]  ;;  %v853_v25 = vpack.c.bf16 %v449_v21, %v448_v20  ;;  %v450_v26 = vld [vmem:[%s1538_s23 + $0x30] sm:$0xff]  ;;  %v451_v27 = vld [vmem:[%s1538_s23 + $0x38] sm:$0xff] }
  0xa0   : > { %849 = vmatprep.subr.bf16.mxu1 %v1214_v4  ;;  %v835_v28 = vpack.c.bf16 %v358_v24, %v357_v23  ;;  %v359_v29 = vld [vmem:[%s1524_s9 + $0x50] sm:$0xff]  ;;  %v360_v30 = vld [vmem:[%s1524_s9 + $0x58] sm:$0xff]  ;;  %v856_v31 = vpack.c.bf16 %v451_v27, %v450_v26  ;;  %v452_v32 = vld [vmem:[%s1538_s23 + $0x40] sm:$0xff] }
  0xa1   : > { %827 = vmatpush3.bf16.msra.mxu0 %v826_v8  ;;  %v453_v33 = vld [vmem:[%s1538_s23 + $0x48] sm:$0xff]  ;;  %v838_v34 = vpack.c.bf16 %v360_v30, %v359_v29  ;;  %v361_v35 = vld [vmem:[%s1524_s9 + $0x60] sm:$0xff]  ;;  %v454_v38 = vld [vmem:[%s1538_s23 + $0x50] sm:$0xff] }
  0xa2   : > { %828 = vmatprep.subr.bf16.mxu0 %v1214_v4  ;;  %v362_v36 = vld [vmem:[%s1524_s9 + $0x68] sm:$0xff]  ;;  %v859_v37 = vpack.c.bf16 %v453_v33, %v452_v32  ;;  %v455_v39 = vld [vmem:[%s1538_s23 + $0x58] sm:$0xff]  ;;  %v363_v41 = vld [vmem:[%s1524_s9 + $0x70] sm:$0xff] }
  0xa3   : > { %851 = vmatpush3.bf16.msra.mxu1 %v850_v19  ;;  %v841_v40 = vpack.c.bf16 %v362_v36, %v361_v35  ;;  %v364_v42 = vld [vmem:[%s1524_s9 + $0x78] sm:$0xff]  ;;  %v862_v43 = vpack.c.bf16 %v455_v39, %v454_v38  ;;  %v456_v44 = vld [vmem:[%s1538_s23 + $0x60] sm:$0xff]  ;;  %v457_v45 = vld [vmem:[%s1538_s23 + $0x68] sm:$0xff] }
  0xa4   : > { %852 = vmatprep.subr.bf16.mxu1 %v1214_v4  ;;  %v844_v46 = vpack.c.bf16 %v364_v42, %v363_v41  ;;  %v865_v47 = vpack.c.bf16 %v457_v45, %v456_v44  ;;  %v348_v48 = vld [vmem:[%s1516_s17] sm:$0xff]  ;;  %v710_v52 = vld [vmem:[%s341_s30] ss:$0 sm:$0xff] }
  0xa5   : > { %830 = vmatpush3.bf16.msra.mxu0 %v829_v15  ;;  %v458_v49 = vld [vmem:[%s1538_s23 + $0x70] sm:$0xff]  ;;  %v459_v50 = vld [vmem:[%s1538_s23 + $0x78] sm:$0xff]  ;;  %v443_v57 = vld [vmem:[#allocation2] sm:$0xff] }
  0xa6   : > { %831 = vmatprep.subr.bf16.mxu0 %v1214_v4  ;;  %v868_v51 = vpack.c.bf16 %v459_v50, %v458_v49  ;;  %v712_v62 = vld [vmem:[%s1713_s8] ss:$0 sm:$0xff] (!%p711_p0) }
  0xa7   : > { %854 = vmatpush3.bf16.msra.mxu1 %v853_v25 }
  0xa8   : > { %855 = vmatprep.subr.bf16.mxu1 %v1214_v4 }
  0xa9   : > { %833 = vmatpush3.bf16.msra.mxu0 %v832_v22 }
  0xaa   : > { %834 = vmatprep.subr.bf16.mxu0 %v1214_v4 }
  0xab   : > { %857 = vmatpush3.bf16.msra.mxu1 %v856_v31 }
  0xac   : > { %858 = vmatprep.subr.bf16.mxu1 %v1214_v4 }
  0xad   : > { %836 = vmatpush3.bf16.msra.mxu0 %v835_v28 }
  0xae   : > { %837 = vmatprep.subr.bf16.mxu0 %v1214_v4 }
  0xaf   : > { %860 = vmatpush3.bf16.msra.mxu1 %v859_v37 }
  0xb0   : > { %861 = vmatprep.subr.bf16.mxu1 %v1214_v4 }
  0xb1   : > { %839 = vmatpush3.bf16.msra.mxu0 %v838_v34 }
  0xb2   : > { %840 = vmatprep.subr.bf16.mxu0 %v1214_v4 }
  0xb3   : > { %863 = vmatpush3.bf16.msra.mxu1 %v862_v43 }
  0xb4   : > { %864 = vmatprep.subr.bf16.mxu1 %v1214_v4 }
  0xb5   : > { %842 = vmatpush3.bf16.msra.mxu0 %v841_v40 }
  0xb6   : > { %843 = vmatprep.subr.bf16.mxu0 %v1214_v4 }
  0xb7   : > { %866 = vmatpush3.bf16.msra.mxu1 %v865_v47 }
  0xb8   : > { %867 = vmatprep.subr.bf16.mxu1 %v1214_v4 }
  0xb9   : > { %845 = vmatpush3.bf16.msra.mxu0 %v844_v46 }
  0xbb   : > { %869 = vmatpush3.bf16.msra.mxu1 %v868_v51 }
  0xbc   : > { %785 = vmatmul.mubr.f32.vlgmr.msra.gmra.mrb[0].mxu0 %v348_v48 }
 0x18f   : > { %v438_v53 = vpop.f32.mrb[0].mxu0 }
 0x190   : > { %v439_v54 = vadd.f32 %v710_v52, %v438_v53  ;;  %v786_v55 = vpop.f32.mrb[1].mxu0 }
 0x192   : > { %v442_v56 = vmax.f32 %v439_v54, 0.0 }
 0x194   : > { %820 = vmatmul.mubr.f32.vlgmr.msra.gmra.mrb[0].mxu1 %v442_v56 }
 0x264   : > { %535 = sbr.rel (%p711_p0) target bundleno = 629 (0x275), region = 60 }
 0x267   : > { %v526_v58 = vpop.f32.mrb[0].mxu1 }
 0x268   : > { %v530_v59 = vadd.f32 %v526_v58, %v443_v57  ;;  %v821_v60 = vpop.f32.mrb[1].mxu1 }
 0x26a   : > { %531 = vst [vmem:[#allocation2] sm:$0xff] %v530_v59 }
 0x271   : > { %v536_v61 = vld [vmem:[#allocation2] sm:$0xff] }
 0x272   : > { %v544_v63 = vadd.f32 %v712_v62, %v536_v61 }
 0x274   : > { %545 = vst [vmem:[%s1540_s18] sm:$0xff] %v544_v63 }
 0x275 PF: > { %s1714_s17 = sld [smem:[#allocation14_spill]]  ;;  %s1715_s4 = sld [smem:[#allocation23_spill]] }
 0x276   : > { %s560_s24 = sshll.u32 %s1540_s18, 4  ;;  %s547_s1 = scalar_lea.sflag [#allocation5], %s1512_s13  ;;  %s561_s24 = int_to_ptr.vmem [resolvable:$true] %s560_s24 }
 0x277   : > { %s1079_s7 = scalar_lea.vmem %s561_s24, 128  ;;  %p1716_p13 = scmp.ne.s32.totalorder %s1700_s5, 0 }
 0x278   : > { %p1080_p3 = scmp.ne.s32.totalorder %s561_s24, %s1079_s7  ;;  %s1217_s25 = smov [#allocation9]  }
 0x279   : > { %s1083_s11 = sshll.u32 %s1217_s25, 4  ;;  %s1084_s11 = int_to_ptr.vmem [resolvable:$false] %s1083_s11 }
 0x27a   : > { %p1081_p9 = pnand %p1080_p3, %p1716_p13  ;;  %s1085_s30 = scalar_lea.vmem %s1084_s11, 256 }
 0x27b   : > { %s714_s12 = sshll.u32 %s1714_s17, 7  ;;  %p1086_p11 = scmp.lt.s32.totalorder %s561_s24, %s1084_s11 }
 0x27c   : > { %s1606_s9 = scalar_lea.hbm %s1715_s4, %s714_s12  ;;  %p1082_p12 = pneg %p1081_p9 }
 0x27d   : > { %p1087_p2 = scmp.lt.s32.totalorder %s1085_s30, %s1079_s7 }
 0x27f   : > { %p1088_p1 = por %p1087_p2, %p1086_p11 }
 0x281   : > { %p1089_p5 = pnand %p1088_p1, %p1082_p12 }
 0x283   : > { %1092 = shalt.err (!%p1089_p5)
}
 0x284   : > { %s1093_s13 = scalar_lea.hbm %s1606_s9, 128  ;;  %s1097_s29 = scalar_lea.hbm %s1715_s4, 256 }
 0x285   : > { %p1094_p7 = scmp.ne.s32.totalorder %s1606_s9, %s1093_s13  ;;  %p1098_p10 = scmp.lt.u32.totalorder %s1606_s9, %s1715_s4 }
 0x286   : > { %p1099_p6 = scmp.lt.u32.totalorder %s1097_s29, %s1093_s13  ;;  %p1101_p3 = scmp.lt.u32.totalorder %s1093_s13, %s1606_s9 }
 0x287   : > { %p1095_p8 = pnand %p1094_p7, %p1716_p13 }
 0x288   : > { %p1100_p0 = por %p1099_p6, %p1098_p10 }
 0x289   : > { %p1096_p4 = pneg %p1095_p8 }
 0x28a   : > { %p1102_p9 = por %p1101_p3, %p1100_p0 }
 0x28c   : > { %p1103_p12 = pnand %p1102_p9, %p1096_p4 }
 0x28e   : > { %1106 = shalt.err (!%p1103_p12)
}
 0x28f   : > { %876 = dma.vmem_to_hbm [thread:$0]  (%p1716_p13), %s561_s24, 128, %s1606_s9, %s547_s1  }
 0x290 PF: > { %p893_p11 = scmp.ge.s32.totalorder %s1205_s28, 2  ;;  %s572_s16 = sand.u32 1, %s1177_s21  }
 0x291   : > { %p1717_p2 = scmp.ne.s32.totalorder %s1701_s6, 0  ;;  %s573_s27 = scalar_lea.sflag [#allocation5], %s572_s16 }
 0x293   : > { %p889_p1 = pnand %p893_p11, %p1717_p2 }
 0x295   : > { %1160 = dma.done.wait (!%p889_p1), %s573_s27, 128  }
 0x296   : > { %1162 = vsyncadd (!%p889_p1), %s573_s27, 4294967168  ;;  %s24_s28 = sadd.s32 1, %s1205_s28   ;;  %s1718_s8 = sld [smem:[#allocation18_spill]] }
 0x297   : > { %p21_p5 = scmp.ge.s32.totalorder %s24_s28, 6   ;;  %s1719_s5 = sld [smem:[#allocation13_spill]] }
 0x298   : > { %s1720_s23 = sld [smem:[#allocation19_spill]]  ;;  %s1721_s25 = sld [smem:[#allocation15_spill]] }
 0x299   : > { %s1722_s17 = sld [smem:[#allocation16_spill]]  ;;  %s1723_s27 = sld [smem:[#allocation17_spill]] }
 0x29a   : > { %s1724_s18 = smov %s1169_s19  ;;  %s1725_s19 = smov %s1173_s20 }
 0x29b   : > { %s1727_s21 = smov %s1181_s22  ;;  %s1729_s24 = smov %s1197_s26 }
 0x29c   : > { %s1726_s20 = smov %s1718_s8  ;;  %23 = sbr.rel (!%p21_p5) target bundleno = 16 (0x10), region = 120 }
 0x29d   : > { %s1728_s22 = smov %s1719_s5 }
 0x29f   : > { %s1730_s26 = smov %s1722_s17 }
 0x2a3   :  { %578 = vsyncpa [#allocation4], 1 }
 0x2a4   :  { %580 = vsyncpa [#allocation4 + $0x1], 1 }
 0x2a5   :  { %581 = vsyncpa [#allocation7], 1 }
 0x2a6   :  { %583 = vsyncpa [#allocation7 + $0x1], 1 }
 0x2a7   :  { %584 = vsyncpa [#allocation5], 1 }
 0x2a8   :  { %586 = vsyncpa [#allocation5 + $0x1], 1 }

</bundles_post_ra>
